<compile_context>
chip_gen: v7x
topology: tpu7x:2x2x1
jax: 0.10.0
libtpu: 0.0.40
codegen_flags: <defaults>
</compile_context>

<pallas_src>
import functools

import jax
import jax.numpy as jnp
from jax.experimental import pallas as pl
from jax.experimental.pallas import tpu as pltpu

_LANE = 128
_MIB = 1024 * 1024
# Keep the whole (rows, 1) bias resident in VMEM only while its lane-padded
# footprint stays small; above this fall back to per-row-block bias tiles.
_RESIDENT_BIAS_MAX_BYTES = 2 * _MIB


def _round_up(x: int, m: int) -> int:
    return ((x + m - 1) // m) * m


def _round_down(x: int, m: int) -> int:
    return (x // m) * m


def _sublane_packing(itemsize: int) -> int:
    # Sub-32-bit dtypes pack along sublanes: f32 -> 8, bf16 -> 16, int8 -> 32.
    return max(8, 32 // itemsize)


def _target_block_bytes() -> int:
    """Per-x-block byte target, tuned per chip generation."""
    try:
        kind = jax.devices()[0].device_kind.lower()
    except Exception:
        kind = ""
    # v5e (~0.8 TB/s HBM): 4 MiB blocks already keep the ~0.35us/step
    # overhead <4%; larger blocks only add VMEM pressure.
    if "v5" in kind:
        return 4 * _MIB
    # v6e / v7x (~1.4-3.2 TB/s HBM): ~8 MiB blocks keep step overhead ~5-6%.
    return 8 * _MIB


def _pick_tiles(rows: int, hw: int, itemsize: int, target_bytes: int,
                bias_blocked: bool):
    """Pick (row_tile, lane_tile) near target_bytes per x block."""
    packing = _sublane_packing(itemsize)
    # Lane-padded bytes one bias row occupies in VMEM when blocked per row tile.
    bias_row_bytes = (4096 // packing) if bias_blocked else 0

    # Lane tile: keep the full H*W whenever a minimum-height block fits the
    # budget (full last dim is always layout-legal); otherwise tile the lane
    # axis in 128-lane multiples so blocks never exceed the budget (large H*W).
    if hw <= _LANE or hw * itemsize * packing <= target_bytes:
        lane_tile = hw
    else:
        max_lane = _round_down(target_bytes // (itemsize * packing), _LANE)
        lane_tile = min(max(max_lane, _LANE), _round_down(hw, _LANE))

    # Row tile: biggest multiple of the sublane packing keeping the
    # (lane-padded) x block plus its bias tile near the target.
    padded_lane_bytes = _round_up(lane_tile, _LANE) * itemsize
    per_row_bytes = padded_lane_bytes + bias_row_bytes
    row_tile = max(packing, _round_down(target_bytes // per_row_bytes, packing))
    if row_tile >= rows:
        row_tile = rows  # full dim -> always layout-legal

    # v7x megacore: make sure the (fully parallel) grid has >= 2 steps so both
    # TensorCores get work; prefer splitting lanes (keeps bias on one row
    # block), else split rows.  No-op on v5e/v6e (single TC) beyond overhead.
    n_row_blocks = pl.cdiv(rows, row_tile)
    n_lane_blocks = pl.cdiv(hw, lane_tile)
    if n_row_blocks * n_lane_blocks < 2:
        if lane_tile == hw and hw >= 2 * _LANE:
            lane_tile = _round_up(pl.cdiv(hw, 2), _LANE)
        elif rows >= 2 * packing:
            row_tile = _round_up(pl.cdiv(rows, 2), packing)

    return row_tile, lane_tile


def _bias_add_kernel_blocked(x_ref, b_ref, o_ref):
    # x_ref: (row_tile, lane_tile); b_ref: (row_tile, 1) -> lane splat on VPU.
    o_ref[...] = x_ref[...] + b_ref[...]


def _bias_add_kernel_resident(x_ref, b_ref, o_ref, *, row_tile):
    # b_ref holds the whole (padded) per-row bias column, resident in VMEM;
    # slice out this row block (start is sublane-aligned: row_tile % packing == 0).
    start = pl.multiple_of(pl.program_id(0) * row_tile, row_tile)
    o_ref[...] = x_ref[...] + b_ref[pl.ds(start, row_tile), :]


def learnable_bias(x: jax.Array, bias: jax.Array, *, block_bytes: int | None = None):
    """out = x + bias.expand_as(x); x: (N, C, H, W), bias: (1, C, 1, 1)."""
    n, c, h, w = x.shape
    assert bias.shape == (1, c, 1, 1), bias.shape
    bias = bias.astype(x.dtype)

    rows, hw = n * c, h * w
    itemsize = jnp.dtype(x.dtype).itemsize
    packing = _sublane_packing(itemsize)

    # Lane-dense 2-D view: one row per (n, c) pair, lanes = flattened spatial.
    # TODO(synk): when H*W is not a 128 multiple the last vreg per row is a
    # masked store and rows lane-pad up to the next 128 multiple; the padding
    # is accounted for in the budgets below but cannot be removed without a
    # different memory layout (bias is strictly per (n, c) row).
    x2 = x.reshape(rows, hw)
    b2 = jnp.broadcast_to(bias.reshape(1, c), (n, c)).reshape(rows, 1)

    resident_bias_bytes = _round_up(rows, packing) * (4096 // packing)
    prefer_resident = resident_bias_bytes <= _RESIDENT_BIAS_MAX_BYTES

    target_bytes = _target_block_bytes() if block_bytes is None else block_bytes
    row_tile, lane_tile = _pick_tiles(rows, hw, itemsize, target_bytes,
                                      bias_blocked=not prefer_resident)
    n_row_blocks = pl.cdiv(rows, row_tile)
    n_lane_blocks = pl.cdiv(hw, lane_tile)
    grid = (n_row_blocks, n_lane_blocks)

    x_spec = pl.BlockSpec((row_tile, lane_tile), lambda i, j: (i, j))
    out_spec = pl.BlockSpec((row_tile, lane_tile), lambda i, j: (i, j))

    # Resident bias only pays off with multiple row blocks; with a single row
    # block the blocked spec is fetched exactly once anyway.
    bias_resident = prefer_resident and n_row_blocks > 1
    if bias_resident:
        # Pad so the in-kernel dynamic slice of the last row block stays in
        # bounds (zeros; padded rows are never written back).
        rows_padded = n_row_blocks * row_tile
        if rows_padded > rows:
            b2 = jnp.pad(b2, ((0, rows_padded - rows), (0, 0)))
        bias_spec = pl.BlockSpec((rows_padded, 1), lambda i, j: (0, 0))
        kernel = functools.partial(_bias_add_kernel_resident, row_tile=row_tile)
        bias_vmem_bytes = 2 * _round_up(rows_padded, packing) * (4096 // packing)
    else:
        # Lane axis iterates innermost, so this block is re-DMA'd only when
        # the row block index changes.
        bias_spec = pl.BlockSpec((row_tile, 1), lambda i, j: (i, 0))
        kernel = _bias_add_kernel_blocked
        bias_vmem_bytes = 2 * row_tile * (4096 // packing)

    # VMEM budget: double-buffered x in + out blocks (lane-padded) + bias
    # buffers + headroom for Mosaic internal scratch; clamped under v7x's
    # 64 MiB/TC physical VMEM.
    x_block_bytes = row_tile * _round_up(lane_tile, _LANE) * itemsize
    vmem_limit = 4 * x_block_bytes + bias_vmem_bytes + 8 * _MIB
    vmem_limit = max(16 * _MIB, min(vmem_limit, 56 * _MIB))

    out2 = pl.pallas_call(
        kernel,
        out_shape=jax.ShapeDtypeStruct((rows, hw), x.dtype),
        grid_spec=pltpu.PrefetchScalarGridSpec(
            num_scalar_prefetch=0,
            grid=grid,
            in_specs=[x_spec, bias_spec],
            out_specs=out_spec,
        ),
        compiler_params=pltpu.CompilerParams(
            dimension_semantics=("parallel", "parallel"),
            vmem_limit_bytes=vmem_limit,
        ),
        cost_estimate=pl.CostEstimate(
            flops=rows * hw,
            transcendentals=0,
            bytes_accessed=2 * rows * hw * itemsize + rows * itemsize,
        ),
    )(x2, b2)

    return out2.reshape(n, c, h, w)


def _check(x, bias, **kw):
    out = learnable_bias(x, bias, **kw)
    jax.block_until_ready(out)
    ref = x + jnp.broadcast_to(bias.astype(x.dtype), x.shape)
    assert out.shape == x.shape and out.dtype == x.dtype
    assert jnp.allclose(out.astype(jnp.float32), ref.astype(jnp.float32),
                        atol=1e-5, rtol=1e-5), "mismatch vs reference"
    return out


if __name__ == "__main__":
    key = jax.random.PRNGKey(0)
    kx, kb, kx2, kb2, kx3, kb3 = jax.random.split(key, 6)

    # Primary shape (matches the module's typical NCHW usage).
    N, C, H, W = 2, 4, 16, 16
    x = jax.random.normal(kx, (N, C, H, W), dtype=jnp.float32)
    # nn.Parameter(torch.zeros(1, C, 1, 1)) -> zeros; perturb deterministically
    # so the add is actually exercised.
    bias = 0.1 * jax.random.normal(kb, (1, C, 1, 1), dtype=jnp.float32)
    _check(x, bias)

    # Exercise the resident-bias path (multiple row blocks) with a small
    # forced block budget.
    x2 = jax.random.normal(kx2, (2, 16, 32, 32), dtype=jnp.float32)
    b2 = 0.1 * jax.random.normal(kb2, (1, 16, 1, 1), dtype=jnp.float32)
    _check(x2, b2, block_bytes=64 * 1024)

    # Exercise bf16 sublane packing and a non-128-multiple H*W (masked lanes).
    x3 = jax.random.normal(kx3, (2, 3, 14, 14), dtype=jnp.bfloat16)
    b3 = (0.1 * jax.random.normal(kb3, (1, 3, 1, 1))).astype(jnp.bfloat16)
    _check(x3, b3)

    print("KERNEL_OK")
</pallas_src>

<mosaic_0001>
module attributes {stable_mosaic.version = 11 : i64} {
  func.func @_bias_add_kernel_blocked(%arg0: i32, %arg1: i32, %arg2: memref<8x128xf32, #tpu.memory_space<vmem>>, %arg3: memref<8x1xf32, #tpu.memory_space<vmem>>, %arg4: memref<8x128xf32, #tpu.memory_space<vmem>>) attributes {dimension_semantics = [#tpu.dimension_semantics<parallel>, #tpu.dimension_semantics<parallel>], iteration_bounds = array<i64: 1, 2>, scalar_prefetch = 0 : i64, scratch_operands = 0 : i64, tpu.core_type = #tpu.core_type<tc>, window_params = [{transform_indices = @transform_0, window_bounds = array<i64: 8, 128>}, {transform_indices = @transform_1, window_bounds = array<i64: 8, 1>}, {transform_indices = @transform_2, window_bounds = array<i64: 8, 128>}]} {
    %c0 = arith.constant 0 : index
    %c0_0 = arith.constant 0 : index
    %0 = vector.load %arg2[%c0, %c0_0] : memref<8x128xf32, #tpu.memory_space<vmem>>, vector<8x128xf32>
    %c0_1 = arith.constant 0 : index
    %c0_2 = arith.constant 0 : index
    %1 = vector.load %arg3[%c0_1, %c0_2] : memref<8x1xf32, #tpu.memory_space<vmem>>, vector<8x1xf32>
    %2 = vector.broadcast %1 : vector<8x1xf32> to vector<8x128xf32>
    %3 = arith.addf %0, %2 : vector<8x128xf32>
    %c0_3 = arith.constant 0 : index
    %c0_4 = arith.constant 0 : index
    %4 = vector.load %arg4[%c0_3, %c0_4] : memref<8x128xf32, #tpu.memory_space<vmem>>, vector<8x128xf32>
    tpu.vector_store %arg4[%c0_3, %c0_4], %3 {strides = array<i32>} : memref<8x128xf32, #tpu.memory_space<vmem>>, vector<8x128xf32>,
    return
  }
  func.func @transform_0(%arg0: i32, %arg1: i32) -> (i32, i32) {
    %c0_i32 = arith.constant 0 : i32
    return %arg0, %arg1 : i32, i32
  }
  func.func @transform_1(%arg0: i32, %arg1: i32) -> (i32, i32) {
    %c0_i32 = arith.constant 0 : i32
    %c0_i32_0 = arith.constant 0 : i32
    return %arg0, %c0_i32 : i32, i32
  }
  func.func @transform_2(%arg0: i32, %arg1: i32) -> (i32, i32) {
    %c0_i32 = arith.constant 0 : i32
    return %arg0, %arg1 : i32, i32
  }
}

</mosaic_0001>

<bundles_post_ra>
// kernel: tpu_custom_call.1
= control target key start
LH: loop header
LB: loop body
LE: loop exit
PB: predicated region body
PF: predicated region fallthrough
CT: control target
= control target key end

     0   :  { %7 = vsyncpa [#allocation3], 0  ;;  %s701_s0 = inlined_call_operand.hbm [shape: f32[8,256], index: 0, kind: input, shape index: {}]   ;;  %s702_s1 = inlined_call_operand.vmem [shape: f32[8,1], index: 1, kind: input, shape index: {}]   ;;  %s703_s2 = inlined_call_operand.hbm [shape: f32[8,256], index: 2, kind: output, shape index: {}]  }
   0x1   :  { %9 = vsyncpa [#allocation3 + $0x1], 0 }
   0x2   :  { %10 = vsyncpa [#allocation4], 0 }
   0x3   :  { %12 = vsyncpa [#allocation4 + $0x1], 0  ;;  %s526_s9 = smov 0   ;;  %s528_s10 = smov 0  }
   0x4   :  { %s530_s11 = smov 0   ;;  %s532_s12 = smov 0  }
   0x5   :  { %s534_s13 = smov 0   ;;  %s536_s14 = smov 0  }
   0x6 LB: > { %s316_s15 = sadd.s32 4294967295, %s506_s14   ;;  %s317_s16 = sadd.s32 4294967294, %s506_s14   ;;  %s506_s14 = sphi %s536_s14, %s18_s14   ;;  %s502_s13 = sphi %s534_s13, %s719_s13   ;;  %s498_s12 = sphi %s532_s12, %s718_s12   ;;  %s494_s11 = sphi %s530_s11, %s717_s11   ;;  %s490_s10 = sphi %s528_s10, %s716_s10   ;;  %s486_s9 = sphi %s526_s9, %s715_s9  }
   0x7   : > { %s27_s17 = sadd.s32 1, %s502_s13  ;;  %s39_s18 = sadd.s32 1, %s494_s11 }
   0x8   : > { %p28_p0 = scmp.ge.s32.totalorder %s27_s17, 2  ;;  %p46_p1 = scmp.ne.s32.totalorder %s494_s11, %s490_s10 }
   0x9   : > { %p47_p2 = scmp.eq.s32.totalorder %s506_s14, 0  ;;  %p52_p3 = scmp.ne.s32.totalorder %s490_s10, %s486_s9 }
   0xa   : > { %s721_s17 = smov (%p28_p0, %s27_s17), 0  ;;  %p53_p5 = scmp.eq.s32.totalorder %s316_s15, 0 }
   0xb   : > { %p567_p4 = por %p47_p2, %p46_p1  ;;  %s35_s20 = ssub.s32 %s502_s13, %s721_s17 }
   0xc   : > { %p104_p6 = scmp.eq.s32.totalorder %s316_s15, 1  ;;  %p37_p7 = scmp.eq.s32.totalorder %s35_s20, 0 }
   0xd   : > { %p573_p8 = por %p53_p5, %p52_p3  ;;  %p110_p10 = scmp.eq.s32.totalorder %s317_s16, 1 }
   0xe   : > { %p577_p9 = por %p104_p6, %p46_p1  ;;  %p342_p13 = scmp.lt.s32.totalorder %s506_s14, 2 }
   0xf   : > { %s582_s23 = scalar_select %p37_p7, %s494_s11, %s39_s18  }
  0x10   : > { %s707_s22 = scalar_select %p577_p9, 1, 0 }
  0x11   : > { %p584_p11 = por %p110_p10, %p52_p3  ;;  %s137_s25 = sand.u32 1, %s494_s11  }
  0x12   : > { %s321_s26 = sshll.u32 %s137_s25, 3  ;;  %s322_s27 = sshll.u32 %s502_s13, 7 }
  0x13   : > { %s708_s24 = scalar_select %p584_p11, 1, 0 }
  0x14   : > { %s595_s30 = scalar_lea.hbm %s701_s0, %s322_s27  ;;  %s141_s3 = scalar_lea.vmem [#allocation2], %s321_s26 }
  0x15   : > { %s150_s4 = sshll.u32 %s141_s3, 4  ;;  %p601_p0 = pnand %p342_p13, %p567_p4  ;;  %s597_s4 = int_to_ptr.vmem [resolvable:$true] %s150_s4 }
  0x16   : > { %s138_s6 = scalar_lea.sflag [#allocation3], %s137_s25  ;;  %s394_s7 = scalar_lea.hbm %s595_s30, 128 }
  0x17   : > { %p395_p3 = scmp.ne.s32.totalorder %s595_s30, %s394_s7  ;;  %p396_p5 = pneg %p601_p0 }
  0x18   : > { %s399_s16 = scalar_lea.hbm %s701_s0, 256  ;;  %p400_p4 = scmp.lt.u32.totalorder %s595_s30, %s701_s0 }
  0x19   : > { %p397_p6 = pnand %p396_p5, %p395_p3  ;;  %p401_p10 = scmp.lt.u32.totalorder %s399_s16, %s394_s7 }
  0x1a   : > { %p403_p12 = scmp.lt.u32.totalorder %s394_s7, %s595_s30 }
  0x1b   : > { %p398_p7 = pneg %p397_p6  ;;  %p402_p13 = por %p401_p10, %p400_p4 }
  0x1d   : > { %p404_p1 = por %p403_p12, %p402_p13 }
  0x1f   : > { %p405_p2 = pnand %p404_p1, %p398_p7 }
  0x21   : > { %408 = shalt.err (!%p405_p2)
}
  0x22   : > { %s409_s20 = scalar_lea.vmem %s597_s4, 128  ;;  %s508_s25 = smov [#allocation2]  }
  0x23   : > { %p410_p3 = scmp.ne.s32.totalorder %s597_s4, %s409_s20  ;;  %s414_s26 = sshll.u32 %s508_s25, 4  ;;  %s415_s26 = int_to_ptr.vmem [resolvable:$false] %s414_s26 }
  0x24   : > { %s416_s27 = scalar_lea.vmem %s415_s26, 256  ;;  %p417_p9 = scmp.lt.s32.totalorder %s597_s4, %s415_s26 }
  0x25   : > { %p412_p6 = pnand %p410_p3, %p396_p5  ;;  %p418_p4 = scmp.lt.s32.totalorder %s416_s27, %s409_s20 }
  0x27   : > { %p413_p11 = pneg %p412_p6  ;;  %p419_p10 = por %p418_p4, %p417_p9 }
  0x29   : > { %p420_p12 = pnand %p419_p10, %p413_p11 }
  0x2b   : > { %423 = shalt.err (!%p420_p12)
}
  0x2c   : > { %337 = dma.hbm_to_vmem [thread:$0]  (!%p601_p0), %s595_s30, 128, %s597_s4, %s138_s6  }
  0x2d   : > { %p710_p1 = scmp.lt.s32.totalorder %s506_s14, 3  ;;  %p711_p2 = scmp.ge.s32.totalorder %s506_s14, 1 }
  0x2f   : > { %p156_p5 = pnand %p711_p2, %p710_p1 }
  0x30   : > { %s637_s28 = sand.u32 (!%p156_p5), 1, %s490_s10  }
  0x31   : > { %159 = sbr.rel (%p156_p5) target bundleno = 203 (0xcb), region = 28  ;;  %s324_s29 = sshll.u32 (!%p156_p5), %s637_s28, 3 }
  0x32   : > { %s162_s3 = scalar_lea.sflag (!%p156_p5), [#allocation3], %s637_s28  ;;  %s165_s7 = scalar_lea.vmem (!%p156_p5), [#allocation2], %s324_s29 }
  0x38   : > { %477 = dma.done.wait (%p573_p8), %s162_s3, 128  }
  0x39   : > { %479 = vsyncadd (%p573_p8), %s162_s3, 4294967168  ;;  %v509_v0 = vmov 0   ;;  %v195_v1 = vld [vmem:[%s702_s1] sm:$0xff]  ;;  %s327_s5 = sshll.u32 %s498_s12, 7  ;;  %s189_s6 = scalar_lea.vmem [#allocation5], %s324_s29 }
  0x3a   : > { %393 = vset.pattern.permute.xlu0 %v509_v0  ;;  %v194_v2 = vld [vmem:[%s165_s7] sm:$0xff]  ;;  %s219_s8 = sshll.u32 %s189_s6, 4  ;;  %s652_s21 = scalar_lea.hbm %s703_s2, %s327_s5  ;;  %s654_s8 = int_to_ptr.vmem [resolvable:$true] %s219_s8 }
  0x3b   : > { %198 = vperm.xlu0 %393, %v195_v1   ;;  %s204_s18 = scalar_lea.sflag [#allocation4], %s637_s28  ;;  %s424_s19 = scalar_lea.vmem %s654_s8, 128 }
  0x3c   : > { %p425_p8 = scmp.ne.s32.totalorder %s654_s8, %s424_s19  ;;  %p712_p9 = scmp.ne.s32.totalorder %s707_s22, 0 }
  0x3d   : > { %s510_s12 = smov [#allocation5]  }
  0x3e   : > { %p426_p11 = pnand %p425_p8, %p712_p9  ;;  %s428_s20 = sshll.u32 %s510_s12, 4  ;;  %s429_s20 = int_to_ptr.vmem [resolvable:$false] %s428_s20 }
  0x3f   : > { %s430_s25 = scalar_lea.vmem %s429_s20, 256  ;;  %p431_p7 = scmp.lt.s32.totalorder %s654_s8, %s429_s20 }
  0x40   : > { %p427_p0 = pneg %p426_p11  ;;  %p432_p13 = scmp.lt.s32.totalorder %s430_s25, %s424_s19 }
  0x42   : > { %p433_p3 = por %p432_p13, %p431_p7 }
  0x44   : > { %p434_p6 = pnand %p433_p3, %p427_p0 }
  0xba   : > { %v199_v3 = vpop.permute.xlu0 %198 }
  0xbb   : > { %v201_v4 = vadd.f32 %v199_v3, %v194_v2 }
  0xbd   : > { %202 = vst [vmem:[%s189_s6] sm:$0xff] %v201_v4 }
  0xbe   : > { %437 = shalt.err (!%p434_p6)
}
  0xbf   : > { %s438_s26 = scalar_lea.hbm %s652_s21, 128  ;;  %s442_s29 = scalar_lea.hbm %s703_s2, 256 }
  0xc0   : > { %p439_p4 = scmp.ne.s32.totalorder %s652_s21, %s438_s26  ;;  %p443_p1 = scmp.lt.u32.totalorder %s652_s21, %s703_s2 }
  0xc1   : > { %p444_p2 = scmp.lt.u32.totalorder %s442_s29, %s438_s26  ;;  %p446_p8 = scmp.lt.u32.totalorder %s438_s26, %s652_s21 }
  0xc2   : > { %p440_p10 = pnand %p439_p4, %p712_p9 }
  0xc3   : > { %p445_p5 = por %p444_p2, %p443_p1 }
  0xc4   : > { %p441_p12 = pneg %p440_p10 }
  0xc5   : > { %p447_p11 = por %p446_p8, %p445_p5 }
  0xc7   : > { %p448_p0 = pnand %p447_p11, %p441_p12 }
  0xc9   : > { %451 = shalt.err (!%p448_p0)
}
  0xca   : > { %332 = dma.vmem_to_hbm [thread:$0]  (%p712_p9), %s654_s8, 128, %s652_s21, %s204_s18  }
  0xcb PF: > { %s231_s30 = sand.u32 1, %s486_s9   ;;  %p713_p7 = scmp.ne.s32.totalorder %s708_s24, 0 }
  0xcc   : > { %p714_p13 = scmp.ge.s32.totalorder %s506_s14, 2  ;;  %s232_s4 = scalar_lea.sflag [#allocation4], %s231_s30 }
  0xce   : > { %p339_p3 = pnand %p714_p13, %p713_p7 }
  0xd0   : > { %481 = dma.done.wait (!%p339_p3), %s232_s4, 128  }
  0xd1   : > { %483 = vsyncadd (!%p339_p3), %s232_s4, 4294967168  ;;  %s18_s14 = sadd.s32 1, %s506_s14   ;;  %s715_s9 = smov %s490_s10 }
  0xd2   : > { %p15_p6 = scmp.ge.s32.totalorder %s18_s14, 4   ;;  %s716_s10 = smov %s494_s11 }
  0xd3   : > { %s717_s11 = smov %s582_s23  ;;  %s718_s12 = smov %s502_s13 }
  0xd4   : > { %s719_s13 = smov %s721_s17  ;;  %17 = sbr.rel (!%p15_p6) target bundleno = 6 (0x6), region = 76 }
  0xdb   :  { %237 = vsyncpa [#allocation3], 1 }
  0xdc   :  { %239 = vsyncpa [#allocation3 + $0x1], 1 }
  0xdd   :  { %240 = vsyncpa [#allocation4], 1 }
  0xde   :  { %242 = vsyncpa [#allocation4 + $0x1], 1 }

</bundles_post_ra>
